<compile_context>
chip_gen: v6e
topology: v6e:2x2x1
jax: 0.10.0
libtpu: 0.0.40
codegen_flags: <defaults>
</compile_context>

<pallas_src>
import jax
import jax.numpy as jnp
from jax.experimental import pallas as pl
from jax.experimental.pallas import tpu as pltpu

_LANE = 128
# Target ~8 MiB of HBM traffic per grid step (3 channels in + 1 channel out).
_STEP_BYTES = 8 * 1024 * 1024
# Keep at least this many total grid steps when the image is large enough
# (>= 4 steps per v7x TensorCore for megacore sharding + pipelining).
_MIN_GRID_STEPS = 8
# Double-buffered working set at the 8 MiB/step target is 16 MiB; give the
# compiler explicit headroom (also lifts v5e's 16 MiB scoped-VMEM default).
_VMEM_LIMIT_BYTES = 32 * 1024 * 1024


def _round_up(x: int, m: int) -> int:
    return (x + m - 1) // m * m


def _bgr_to_gray_kernel(x_ref, o_ref):
    # x_ref block: (1, 3, TR, 128); o_ref block: (1, 1, TR, 128)
    b = x_ref[0, 0, :, :].astype(jnp.float32)  # blue  (channel 0 of BGR)
    g = x_ref[0, 1, :, :].astype(jnp.float32)  # green (channel 1)
    r = x_ref[0, 2, :, :].astype(jnp.float32)  # red   (channel 2)
    gray = 0.299 * r + 0.587 * g + 0.114 * b
    o_ref[0, 0, :, :] = gray.astype(o_ref.dtype)


def bgr_to_grayscale(x: jax.Array) -> jax.Array:
    """x: (*, 3, H, W) BGR image in (0, 1). Returns (*, 1, H, W) grayscale."""
    if x.ndim < 3 or x.shape[-3] != 3:
        raise ValueError(
            f"Input size must have a shape of (*, 3, H, W). Got {x.shape}")
    lead = x.shape[:-3]
    H, W = x.shape[-2], x.shape[-1]
    B = 1
    for d in lead:
        B *= d
    P = H * W
    if B == 0 or P == 0:
        return jnp.zeros(lead + (1, H, W), x.dtype)

    itemsize = jnp.dtype(x.dtype).itemsize
    # Sublane granularity of the second-minor block dim depends on packing.
    sub = {4: 8, 2: 16, 1: 32}.get(itemsize, 8)
    align = sub * _LANE

    # Lane-dense layout: flatten pixels and view them as (rows, 128).
    # Zero-copy when P is already aligned; otherwise pad by < sub*128 pixels
    # (one small pad pass, plus one output slice pass below).
    x3 = x.reshape(B, 3, P)
    p_pad = _round_up(P, align)
    if p_pad != P:
        x3 = jnp.pad(x3, ((0, 0), (0, 0), (0, p_pad - P)))
    rows = p_pad // _LANE  # multiple of `sub`

    # Dtype-aware tile: same bytes per step regardless of dtype.
    # f32 -> 4096 rows (6 MiB in + 2 MiB out), bf16 -> 8192, int8 -> 16384.
    tile_rows = _STEP_BYTES // (4 * _LANE * itemsize)
    tile_rows = max(sub, tile_rows // sub * sub)
    # Keep the grid busy enough for megacore sharding / pipelining.
    if B * pl.cdiv(rows, tile_rows) < _MIN_GRID_STEPS:
        per_batch = pl.cdiv(_MIN_GRID_STEPS, B)
        tile_rows = min(tile_rows, _round_up(pl.cdiv(rows, per_batch), sub))
    tile_rows = max(sub, min(tile_rows, rows))

    grid = (B, pl.cdiv(rows, tile_rows))  # last row-tile may be partial
    x4 = x3.reshape(B, 3, rows, _LANE)

    out4 = pl.pallas_call(
        _bgr_to_gray_kernel,
        out_shape=jax.ShapeDtypeStruct((B, 1, rows, _LANE), x.dtype),
        grid_spec=pltpu.PrefetchScalarGridSpec(
            num_scalar_prefetch=0,
            grid=grid,
            in_specs=[pl.BlockSpec((1, 3, tile_rows, _LANE),
                                   lambda i, r: (i, 0, r, 0))],
            out_specs=pl.BlockSpec((1, 1, tile_rows, _LANE),
                                   lambda i, r: (i, 0, r, 0)),
        ),
        compiler_params=pltpu.CompilerParams(
            dimension_semantics=("parallel", "parallel"),
            vmem_limit_bytes=_VMEM_LIMIT_BYTES,
        ),
        cost_estimate=pl.CostEstimate(
            flops=5 * B * P,                       # 3 mul + 2 add per pixel
            transcendentals=0,
            bytes_accessed=4 * B * P * itemsize,   # 3 channels in + 1 out
        ),
    )(x4)

    gray = out4.reshape(B, 1, p_pad)
    if p_pad != P:
        gray = gray[:, :, :P]
    return gray.reshape(lead + (1, H, W))


if __name__ == "__main__":
    key = jax.random.PRNGKey(0)
    k1, k2, k3, k4, k5 = jax.random.split(key, 5)

    def ref_fn(img):
        bb = img[..., 0:1, :, :]
        gg = img[..., 1:2, :, :]
        rr = img[..., 2:3, :, :]
        return 0.299 * rr + 0.587 * gg + 0.114 * bb

    # f32, small spatial size -> small pad + slice path.
    x1 = jax.random.uniform(k1, (2, 3, 16, 16), dtype=jnp.float32)
    o1 = bgr_to_grayscale(x1)
    jax.block_until_ready(o1)
    assert o1.shape == (2, 1, 16, 16), o1.shape
    assert jnp.allclose(o1, ref_fn(x1), atol=1e-6), float(
        jnp.max(jnp.abs(o1 - ref_fn(x1))))

    # Ragged spatial size (17x23).
    x2 = jax.random.uniform(k2, (2, 3, 17, 23), dtype=jnp.float32)
    o2 = bgr_to_grayscale(x2)
    jax.block_until_ready(o2)
    assert o2.shape == (2, 1, 17, 23), o2.shape
    assert jnp.allclose(o2, ref_fn(x2), atol=1e-6), float(
        jnp.max(jnp.abs(o2 - ref_fn(x2))))

    # bf16 input: f32 accumulation in-kernel, output in bf16.
    x3 = jax.random.uniform(k3, (1, 3, 16, 16), dtype=jnp.bfloat16)
    o3 = bgr_to_grayscale(x3)
    jax.block_until_ready(o3)
    assert o3.shape == (1, 1, 16, 16), o3.shape
    assert jnp.allclose(o3.astype(jnp.float32),
                        ref_fn(x3.astype(jnp.float32)), atol=1e-2)

    # Aligned H*W -> zero-copy path, multi-step grid with a partial tail tile.
    x4 = jax.random.uniform(k4, (1, 3, 88, 128), dtype=jnp.float32)
    o4 = bgr_to_grayscale(x4)
    jax.block_until_ready(o4)
    assert o4.shape == (1, 1, 88, 128), o4.shape
    assert jnp.allclose(o4, ref_fn(x4), atol=1e-6), float(
        jnp.max(jnp.abs(o4 - ref_fn(x4))))

    # 3-D input (no leading batch dims), as in the PyTorch docstring.
    x5 = jax.random.uniform(k5, (3, 8, 8), dtype=jnp.float32)
    o5 = bgr_to_grayscale(x5)
    jax.block_until_ready(o5)
    assert o5.shape == (1, 8, 8), o5.shape
    assert jnp.allclose(o5, ref_fn(x5), atol=1e-6)

    print("KERNEL_OK")
</pallas_src>

<mosaic_0001>
module attributes {stable_mosaic.version = 11 : i64} {
  func.func @_bgr_to_gray_kernel(%arg0: i32, %arg1: i32, %arg2: memref<1x3x8x128xf32, #tpu.memory_space<vmem>>, %arg3: memref<1x1x8x128xf32, #tpu.memory_space<vmem>>) attributes {dimension_semantics = [#tpu.dimension_semantics<parallel>, #tpu.dimension_semantics<parallel>], iteration_bounds = array<i64: 2, 1>, scalar_prefetch = 0 : i64, scratch_operands = 0 : i64, tpu.core_type = #tpu.core_type<tc>, window_params = [{transform_indices = @transform_0, window_bounds = array<i64: 1, 3, 8, 128>}, {transform_indices = @transform_1, window_bounds = array<i64: 1, 1, 8, 128>}]} {
    %c0 = arith.constant 0 : index
    %c0_0 = arith.constant 0 : index
    %c0_1 = arith.constant 0 : index
    %c0_2 = arith.constant 0 : index
    %0 = vector.load %arg2[%c0, %c0_0, %c0_1, %c0_2] : memref<1x3x8x128xf32, #tpu.memory_space<vmem>>, vector<1x1x8x128xf32>
    %1 = vector.shape_cast %0 : vector<1x1x8x128xf32> to vector<8x128xf32>
    %c0_3 = arith.constant 0 : index
    %c1 = arith.constant 1 : index
    %c0_4 = arith.constant 0 : index
    %c0_5 = arith.constant 0 : index
    %2 = vector.load %arg2[%c0_3, %c1, %c0_4, %c0_5] : memref<1x3x8x128xf32, #tpu.memory_space<vmem>>, vector<1x1x8x128xf32>
    %3 = vector.shape_cast %2 : vector<1x1x8x128xf32> to vector<8x128xf32>
    %c0_6 = arith.constant 0 : index
    %c2 = arith.constant 2 : index
    %c0_7 = arith.constant 0 : index
    %c0_8 = arith.constant 0 : index
    %4 = vector.load %arg2[%c0_6, %c2, %c0_7, %c0_8] : memref<1x3x8x128xf32, #tpu.memory_space<vmem>>, vector<1x1x8x128xf32>
    %5 = vector.shape_cast %4 : vector<1x1x8x128xf32> to vector<8x128xf32>
    %cst = arith.constant 2.990000e-01 : f32
    %6 = vector.broadcast %cst : f32 to vector<8x128xf32>
    %7 = arith.mulf %6, %5 : vector<8x128xf32>
    %cst_9 = arith.constant 5.870000e-01 : f32
    %8 = vector.broadcast %cst_9 : f32 to vector<8x128xf32>
    %9 = arith.mulf %8, %3 : vector<8x128xf32>
    %10 = arith.addf %7, %9 : vector<8x128xf32>
    %cst_10 = arith.constant 1.140000e-01 : f32
    %11 = vector.broadcast %cst_10 : f32 to vector<8x128xf32>
    %12 = arith.mulf %11, %1 : vector<8x128xf32>
    %13 = arith.addf %10, %12 : vector<8x128xf32>
    %c0_11 = arith.constant 0 : index
    %c0_12 = arith.constant 0 : index
    %c0_13 = arith.constant 0 : index
    %c0_14 = arith.constant 0 : index
    %14 = vector.load %arg3[%c0_11, %c0_12, %c0_13, %c0_14] : memref<1x1x8x128xf32, #tpu.memory_space<vmem>>, vector<1x1x8x128xf32>
    %15 = vector.shape_cast %14 : vector<1x1x8x128xf32> to vector<8x128xf32>
    %16 = vector.shape_cast %13 : vector<8x128xf32> to vector<1x1x8x128xf32>
    tpu.vector_store %arg3[%c0_11, %c0_12, %c0_13, %c0_14], %16 {strides = array<i32>} : memref<1x1x8x128xf32, #tpu.memory_space<vmem>>, vector<1x1x8x128xf32>,
    return
  }
  func.func @transform_0(%arg0: i32, %arg1: i32) -> (i32, i32, i32, i32) {
    %c0_i32 = arith.constant 0 : i32
    %c0_i32_0 = arith.constant 0 : i32
    %c0_i32_1 = arith.constant 0 : i32
    return %arg0, %c0_i32, %arg1, %c0_i32_0 : i32, i32, i32, i32
  }
  func.func @transform_1(%arg0: i32, %arg1: i32) -> (i32, i32, i32, i32) {
    %c0_i32 = arith.constant 0 : i32
    %c0_i32_0 = arith.constant 0 : i32
    %c0_i32_1 = arith.constant 0 : i32
    return %arg0, %c0_i32, %arg1, %c0_i32_0 : i32, i32, i32, i32
  }
}

</mosaic_0001>

<bundles_post_ra>
// kernel: tpu_custom_call.1
= control target key start
LH: loop header
LB: loop body
LE: loop exit
PB: predicated region body
PF: predicated region fallthrough
CT: control target
= control target key end

     0   :  { %6 = vsyncpa [#allocation3], 0  ;;  %s596_s0 = inlined_call_operand.hbm [shape: f32[2,3,8,128], index: 0, kind: input, shape index: {}]   ;;  %s597_s1 = inlined_call_operand.hbm [shape: f32[2,1,8,128], index: 1, kind: output, shape index: {}]  }
   0x1   :  { %8 = vsyncpa [#allocation3 + $0x1], 0 }
   0x2   :  { %9 = vsyncpa [#allocation4], 0 }
   0x3   :  { %11 = vsyncpa [#allocation4 + $0x1], 0  ;;  %s463_s6 = smov 0   ;;  %s465_s7 = smov 0  }
   0x4   :  { %s467_s8 = smov 0   ;;  %s469_s9 = smov 0  }
   0x5   :  { %s471_s10 = smov 0   ;;  %s473_s11 = smov 0  }
   0x6 LB: > { %s259_s12 = sadd.s32 4294967295, %s447_s11   ;;  %s260_s13 = sadd.s32 4294967294, %s447_s11   ;;  %s447_s11 = sphi %s473_s11, %s17_s11   ;;  %s443_s10 = sphi %s471_s10, %s608_s10   ;;  %s439_s9 = sphi %s469_s9, %s607_s9   ;;  %s435_s8 = sphi %s467_s8, %s606_s8   ;;  %s431_s7 = sphi %s465_s7, %s605_s7   ;;  %s427_s6 = sphi %s463_s6, %s604_s6  }
   0x7   : > { %s29_s14 = sadd.s32 1, %s443_s10  ;;  %s38_s15 = sadd.s32 1, %s435_s8 }
   0x8   : > { %p31_p0 = scmp.ge.s32.totalorder %s29_s14, 2  ;;  %p45_p1 = scmp.ne.s32.totalorder %s435_s8, %s431_s7 }
   0x9   : > { %p46_p2 = scmp.eq.s32.totalorder %s447_s11, 0  ;;  %p51_p3 = scmp.ne.s32.totalorder %s431_s7, %s427_s6 }
   0xa   : > { %s610_s14 = smov (%p31_p0, %s29_s14), 0  ;;  %p52_p5 = scmp.eq.s32.totalorder %s259_s12, 0 }
   0xb   : > { %p504_p4 = por %p46_p2, %p45_p1  ;;  %s33_s17 = ssub.s32 %s443_s10, %s610_s14 }
   0xc   : > { %p77_p6 = scmp.eq.s32.totalorder %s259_s12, 1  ;;  %p36_p7 = scmp.eq.s32.totalorder %s33_s17, 0 }
   0xd   : > { %p510_p8 = por %p52_p5, %p51_p3  ;;  %p83_p10 = scmp.eq.s32.totalorder %s260_s13, 1 }
   0xe   : > { %p514_p9 = por %p77_p6, %p45_p1  ;;  %p287_p13 = scmp.lt.s32.totalorder %s447_s11, 2 }
   0xf   : > { %s519_s20 = scalar_select %p36_p7, %s435_s8, %s38_s15  }
  0x10   : > { %p521_p11 = por %p83_p10, %p51_p3  ;;  %s103_s22 = sand.u32 1, %s435_s8  }
  0x11   : > { %s272_s23 = smul.u32 24, %s103_s22  ;;  %p531_p0 = pnand %p287_p13, %p504_p4 }
  0x12   : > { %s273_s24 = smul.u32 384, %s443_s10  ;;  %p264_p1 = scmp.ge.s32.totalorder %s447_s11, 1 }
  0x13   : > { %s107_s29 = scalar_lea.vmem [#allocation2], %s272_s23  ;;  %s104_s2 = scalar_lea.sflag [#allocation3], %s103_s22 }
  0x14   : > { %s114_s28 = scalar_lea.hbm %s596_s0, %s273_s24  ;;  %s115_s30 = sshll.u32 %s107_s29, 4  ;;  %s116_s30 = int_to_ptr.vmem [resolvable:$true] %s115_s30 }
  0x15   : > { %p341_p2 = pneg %p531_p0  ;;  %s352_s3 = scalar_lea.vmem %s116_s30, 384 }
  0x16   : > { %p353_p3 = scmp.ne.s32.totalorder %s116_s30, %s352_s3  ;;  %s449_s4 = smov [#allocation2]  }
  0x17   : > { %s357_s5 = sshll.u32 %s449_s4, 4  ;;  %s358_s5 = int_to_ptr.vmem [resolvable:$false] %s357_s5 }
  0x18   : > { %p355_p5 = pnand %p353_p3, %p341_p2  ;;  %s359_s12 = scalar_lea.vmem %s358_s5, 768 }
  0x19   : > { %p360_p4 = scmp.lt.s32.totalorder %s116_s30, %s358_s5  ;;  %p361_p7 = scmp.lt.s32.totalorder %s359_s12, %s352_s3 }
  0x1a   : > { %p356_p6 = pneg %p355_p5 }
  0x1b   : > { %p362_p10 = por %p361_p7, %p360_p4 }
  0x1d   : > { %p363_p13 = pnand %p362_p10, %p356_p6 }
  0x1f   : > { %366 = shalt.err (!%p363_p13)
}
  0x20   : > { %s450_s13 = smov 128   ;;  %s451_s15 = smov 8  }
  0x21   : > { %282 = dma.hbm_to_vmem [thread:$0]  (!%p531_p0), %s114_s28, 384, %s116_s30, %s104_s2, %s450_s13, %s450_s13, %s451_s15  }
  0x22   : > { %p123_p12 = scmp.lt.s32.totalorder %s447_s11, 3 }
  0x24   : > { %p124_p2 = pnand %p264_p1, %p123_p12 }
  0x25   : > { %s547_s16 = sand.u32 (!%p124_p2), 1, %s431_s7  }
  0x26   : > { %127 = sbr.rel (%p124_p2) target bundleno = 68 (0x44), region = 24  ;;  %s130_s22 = scalar_lea.sflag (!%p124_p2), [#allocation3], %s547_s16 }
  0x27   : > { %s274_s17 = smul.u32 (!%p124_p2), 24, %s547_s16 }
  0x29   : > { %s133_s23 = scalar_lea.vmem (!%p124_p2), [#allocation2], %s274_s17 }
  0x2b   : > { %418 = dma.done.wait (%p510_p8), %s130_s22, 384  }
  0x2c   : > { %420 = vsyncadd (%p510_p8), %s130_s22, 4294966912  ;;  %s265_s24 = sshll.u32 %s547_s16, 3  ;;  %v152_v0 = vld [vmem:[%s133_s23] sm:$0xff]  ;;  %v266_v1 = vld [vmem:[%s133_s23 + $0x8] sm:$0xff]  ;;  %s269_s27 = sshll.u32 %s439_s9, 7 }
  0x2d   : > { %v267_v2 = vld [vmem:[%s133_s23 + $0x10] sm:$0xff]  ;;  %v158_v4 = vmul.f32 0.587, %v266_v1  ;;  %v160_v5 = vmul.f32 0.114, %v152_v0  ;;  %s151_s25 = scalar_lea.vmem [#allocation5], %s265_s24  ;;  %s176_s29 = scalar_lea.hbm %s597_s1, %s269_s27 }
  0x2e   : > { %v157_v3 = vmul.f32 0.299, %v267_v2  ;;  %s178_s26 = sshll.u32 %s151_s25, 4  ;;  %s164_s30 = scalar_lea.sflag [#allocation4], %s547_s16  ;;  %s179_s26 = int_to_ptr.vmem [resolvable:$true] %s178_s26 }
  0x2f   : > { %s367_s2 = scalar_lea.vmem %s179_s26, 128  ;;  %s452_s3 = smov [#allocation5]  }
  0x30   : > { %v159_v6 = vadd.f32 %v158_v4, %v157_v3  ;;  %p368_p8 = scmp.ne.s32.totalorder %s179_s26, %s367_s2  ;;  %s371_s4 = sshll.u32 %s452_s3, 4  ;;  %s372_s4 = int_to_ptr.vmem [resolvable:$false] %s371_s4 }
  0x31   : > { %s373_s5 = scalar_lea.vmem %s372_s4, 256  ;;  %p374_p1 = scmp.lt.s32.totalorder %s179_s26, %s372_s4 }
  0x32   : > { %v161_v7 = vadd.f32 %v160_v5, %v159_v6  ;;  %p369_p12 = pnand %p368_p8, %p514_p9  ;;  %p375_p3 = scmp.lt.s32.totalorder %s373_s5, %s367_s2 }
  0x34   : > { %162 = vst [vmem:[%s151_s25] sm:$0xff] %v161_v7  ;;  %p370_p0 = pneg %p369_p12  ;;  %p376_p5 = por %p375_p3, %p374_p1 }
  0x36   : > { %p377_p6 = pnand %p376_p5, %p370_p0 }
  0x38   : > { %380 = shalt.err (!%p377_p6)
}
  0x39   : > { %s381_s9 = scalar_lea.hbm %s176_s29, 128  ;;  %s385_s15 = scalar_lea.hbm %s597_s1, 256 }
  0x3a   : > { %p382_p4 = scmp.ne.s32.totalorder %s176_s29, %s381_s9  ;;  %p386_p13 = scmp.lt.s32.totalorder %s176_s29, %s597_s1 }
  0x3b   : > { %p387_p2 = scmp.lt.s32.totalorder %s385_s15, %s381_s9 }
  0x3c   : > { %p383_p7 = pnand %p382_p4, %p514_p9 }
  0x3d   : > { %p388_p8 = por %p387_p2, %p386_p13 }
  0x3e   : > { %p384_p10 = pneg %p383_p7 }
  0x40   : > { %p389_p12 = pnand %p388_p8, %p384_p10 }
  0x42   : > { %392 = shalt.err (!%p389_p12)
}
  0x43   : > { %277 = dma.vmem_to_hbm [thread:$0]  (%p514_p9), %s179_s26, 128, %s176_s29, %s164_s30  }
  0x44 PF: > { %s190_s22 = sand.u32 1, %s427_s6   ;;  %p603_p0 = scmp.ge.s32.totalorder %s447_s11, 2 }
  0x45   : > { %s191_s23 = scalar_lea.sflag [#allocation4], %s190_s22 }
  0x46   : > { %p284_p1 = pnand %p603_p0, %p521_p11 }
  0x48   : > { %p285_p3 = pneg %p284_p1 }
  0x4a   : > { %422 = dma.done.wait (%p285_p3), %s191_s23, 128  }
  0x4b   : > { %424 = vsyncadd (%p285_p3), %s191_s23, 4294967168  ;;  %s17_s11 = sadd.s32 1, %s447_s11   ;;  %s604_s6 = smov %s431_s7 }
  0x4c   : > { %p14_p5 = scmp.ge.s32.totalorder %s17_s11, 4   ;;  %s605_s7 = smov %s435_s8 }
  0x4d   : > { %s606_s8 = smov %s519_s20  ;;  %s607_s9 = smov %s443_s10 }
  0x4e   : > { %s608_s10 = smov %s610_s14  ;;  %16 = sbr.rel (!%p14_p5) target bundleno = 6 (0x6), region = 71 }
  0x53   :  { %196 = vsyncpa [#allocation3], 1 }
  0x54   :  { %198 = vsyncpa [#allocation3 + $0x1], 1 }
  0x55   :  { %199 = vsyncpa [#allocation4], 1 }
  0x56   :  { %201 = vsyncpa [#allocation4 + $0x1], 1 }

</bundles_post_ra>
